<compile_context>
chip_gen: v7x
topology: tpu7x:2x2x1
jax: 0.10.0
libtpu: 0.0.40
codegen_flags: <defaults>
</compile_context>

<pallas_src>
import jax
import jax.numpy as jnp
from jax.experimental import pallas as pl
from jax.experimental.pallas import tpu as pltpu

LANES = 128
SUBLANES = 8
DEFAULT_BLOCK_ROWS = 2048  # 2048 * 128 * 4 B = 1 MiB per f32 input block


def masked_mse_loss(pred, target, *, block_rows=DEFAULT_BLOCK_ROWS):
    assert pred.ndim == target.ndim, "inconsistent dimensions"
    assert pred.shape == target.shape, "inconsistent shapes"

    n = pred.size
    tile_elems = SUBLANES * LANES  # 1024
    n_pad = pl.cdiv(n, tile_elems) * tile_elems

    pred_flat = pred.reshape(-1)
    tgt_flat = target.reshape(-1)
    if n_pad != n:
        # Pad only the ragged tail; padded target == 0 -> masked out below.
        pred_flat = jnp.pad(pred_flat, (0, n_pad - n))
        tgt_flat = jnp.pad(tgt_flat, (0, n_pad - n))

    rows = n_pad // LANES                      # always a multiple of 8
    block_rows = max(SUBLANES, (min(block_rows, rows) // SUBLANES) * SUBLANES)
    nblocks = pl.cdiv(rows, block_rows)
    groups = block_rows // SUBLANES

    pred2d = pred_flat.reshape(rows, LANES)
    tgt2d = tgt_flat.reshape(rows, LANES)

    def kernel(pred_ref, tgt_ref, sq_ref, cnt_ref):
        i = pl.program_id(0)
        t = tgt_ref[...].astype(jnp.float32)
        p = pred_ref[...].astype(jnp.float32)
        # Row-validity mask: the last block may be partial; its tail rows hold
        # unspecified VMEM data, so exclude them by logical row index.
        row_ids = i * block_rows + jax.lax.broadcasted_iota(
            jnp.int32, (block_rows, LANES), 0)
        valid = (t > 0.0) & (row_ids < rows)
        d = jnp.where(valid, t - p, 0.0)       # select (not multiply) -> NaN-safe
        sq = d * d
        # Collapse the tile to one (8,128) partial per output: pure VALU adds,
        # no cross-lane reduction inside the kernel.
        sq_ref[0] = jnp.sum(sq.reshape(groups, SUBLANES, LANES), axis=0)
        cnt_ref[0] = jnp.sum(
            valid.astype(jnp.int32).reshape(groups, SUBLANES, LANES), axis=0)

    sq_parts, cnt_parts = pl.pallas_call(
        kernel,
        out_shape=(
            jax.ShapeDtypeStruct((nblocks, SUBLANES, LANES), jnp.float32),
            jax.ShapeDtypeStruct((nblocks, SUBLANES, LANES), jnp.int32),
        ),
        grid_spec=pltpu.PrefetchScalarGridSpec(
            num_scalar_prefetch=0,
            grid=(nblocks,),
            in_specs=[
                pl.BlockSpec((block_rows, LANES), lambda i: (i, 0)),
                pl.BlockSpec((block_rows, LANES), lambda i: (i, 0)),
            ],
            out_specs=(
                pl.BlockSpec((1, SUBLANES, LANES), lambda i: (i, 0, 0)),
                pl.BlockSpec((1, SUBLANES, LANES), lambda i: (i, 0, 0)),
            ),
        ),
        compiler_params=pltpu.CompilerParams(
            dimension_semantics=("parallel",)),
    )(pred2d, tgt2d)

    total_sq = jnp.sum(sq_parts)                        # f32
    total_cnt = jnp.sum(cnt_parts)                      # exact int32 count
    # If no element of target is > 0 this divides by zero (nan), matching
    # torch's mean over an empty selection.
    return total_sq / total_cnt.astype(jnp.float32)


def _ref_loss(pred, target):
    mask = target > 0
    d = jnp.where(mask,
                  target.astype(jnp.float32) - pred.astype(jnp.float32), 0.0)
    return jnp.sum(d * d) / jnp.sum(mask.astype(jnp.float32))


if __name__ == "__main__":
    key = jax.random.PRNGKey(0)
    k1, k2, k3, k4, k5, k6 = jax.random.split(key, 6)

    # Primary case: NCHW like the PyTorch module (zero-copy reshape path).
    B, C, H, W = 2, 4, 16, 16
    pred = jax.random.normal(k1, (B, C, H, W), jnp.float32)
    target = jax.random.normal(k2, (B, C, H, W), jnp.float32)
    loss = jax.block_until_ready(masked_mse_loss(pred, target))
    ref = _ref_loss(pred, target)
    assert jnp.allclose(loss, ref, rtol=1e-5, atol=1e-6), (loss, ref)

    # Multi-block + partial-last-block path (rows=24, block_rows=16).
    pred2 = jax.random.normal(k3, (2, 4, 16, 24), jnp.float32)
    target2 = jax.random.normal(k4, (2, 4, 16, 24), jnp.float32)
    loss2 = jax.block_until_ready(
        masked_mse_loss(pred2, target2, block_rows=16))
    ref2 = _ref_loss(pred2, target2)
    assert jnp.allclose(loss2, ref2, rtol=1e-5, atol=1e-6), (loss2, ref2)

    # Ragged-tail path (numel = 945, padded to 1024) with bf16 inputs.
    pred3 = jax.random.normal(k5, (3, 5, 7, 9), jnp.bfloat16)
    target3 = jax.random.normal(k6, (3, 5, 7, 9), jnp.bfloat16)
    loss3 = jax.block_until_ready(masked_mse_loss(pred3, target3))
    ref3 = _ref_loss(pred3, target3)
    assert jnp.allclose(loss3, ref3, rtol=1e-3, atol=1e-5), (loss3, ref3)

    print("KERNEL_OK")
</pallas_src>

<mosaic_0001>
module attributes {stable_mosaic.version = 11 : i64} {
  func.func @kernel(%arg0: i32, %arg1: memref<16x128xf32, #tpu.memory_space<vmem>>, %arg2: memref<16x128xf32, #tpu.memory_space<vmem>>, %arg3: memref<1x8x128xf32, #tpu.memory_space<vmem>>, %arg4: memref<1x8x128xi32, #tpu.memory_space<vmem>>) attributes {dimension_semantics = [#tpu.dimension_semantics<parallel>], iteration_bounds = array<i64: 1>, scalar_prefetch = 0 : i64, scratch_operands = 0 : i64, tpu.core_type = #tpu.core_type<tc>, window_params = [{transform_indices = @transform_0, window_bounds = array<i64: 16, 128>}, {transform_indices = @transform_1, window_bounds = array<i64: 16, 128>}, {transform_indices = @transform_2, window_bounds = array<i64: 1, 8, 128>}, {transform_indices = @transform_3, window_bounds = array<i64: 1, 8, 128>}]} {
    %c0 = arith.constant 0 : index
    %c0_0 = arith.constant 0 : index
    %0 = vector.load %arg2[%c0, %c0_0] : memref<16x128xf32, #tpu.memory_space<vmem>>, vector<16x128xf32>
    %c0_1 = arith.constant 0 : index
    %c0_2 = arith.constant 0 : index
    %1 = vector.load %arg1[%c0_1, %c0_2] : memref<16x128xf32, #tpu.memory_space<vmem>>, vector<16x128xf32>
    %c16_i32 = arith.constant 16 : i32
    %2 = arith.muli %arg0, %c16_i32 : i32
    %3 = tpu.iota {dimensions = array<i32: 0>} : vector<16x128xi32>
    %4 = vector.broadcast %2 : i32 to vector<16x128xi32>
    %5 = arith.addi %4, %3 : vector<16x128xi32>
    %cst = arith.constant 0.000000e+00 : f32
    %6 = vector.broadcast %cst : f32 to vector<16x128xf32>
    %7 = arith.cmpf ogt, %0, %6 : vector<16x128xf32>
    %c16_i32_3 = arith.constant 16 : i32
    %8 = vector.broadcast %c16_i32_3 : i32 to vector<16x128xi32>
    %9 = arith.cmpi slt, %5, %8 : vector<16x128xi32>
    %10 = arith.andi %7, %9 : vector<16x128xi1>
    %11 = arith.subf %0, %1 : vector<16x128xf32>
    %cst_4 = arith.constant 0.000000e+00 : f32
    %12 = vector.broadcast %cst_4 : f32 to vector<16x128xf32>
    %13 = arith.select %10, %11, %12 : vector<16x128xi1>, vector<16x128xf32>
    %14 = arith.mulf %13, %13 : vector<16x128xf32>
    %15 = vector.shape_cast %14 : vector<16x128xf32> to vector<2x8x128xf32>
    %cst_5 = arith.constant dense<0.000000e+00> : vector<8x128xf32>
    %16 = vector.multi_reduction <add>, %15, %cst_5 [0] : vector<2x8x128xf32> to vector<8x128xf32>
    %c0_6 = arith.constant 0 : index
    %c0_7 = arith.constant 0 : index
    %c0_8 = arith.constant 0 : index
    %17 = vector.load %arg3[%c0_6, %c0_7, %c0_8] : memref<1x8x128xf32, #tpu.memory_space<vmem>>, vector<1x8x128xf32>
    %18 = vector.shape_cast %17 : vector<1x8x128xf32> to vector<8x128xf32>
    %19 = vector.shape_cast %16 : vector<8x128xf32> to vector<1x8x128xf32>
    tpu.vector_store %arg3[%c0_6, %c0_7, %c0_8], %19 {strides = array<i32>} : memref<1x8x128xf32, #tpu.memory_space<vmem>>, vector<1x8x128xf32>,
    %20 = arith.extui %10 : vector<16x128xi1> to vector<16x128xi32>
    %21 = vector.shape_cast %20 : vector<16x128xi32> to vector<2x8x128xi32>
    %cst_9 = arith.constant dense<0> : vector<8x128xi32>
    %22 = vector.multi_reduction <add>, %21, %cst_9 [0] : vector<2x8x128xi32> to vector<8x128xi32>
    %c0_10 = arith.constant 0 : index
    %c0_11 = arith.constant 0 : index
    %c0_12 = arith.constant 0 : index
    %23 = vector.load %arg4[%c0_10, %c0_11, %c0_12] : memref<1x8x128xi32, #tpu.memory_space<vmem>>, vector<1x8x128xi32>
    %24 = vector.shape_cast %23 : vector<1x8x128xi32> to vector<8x128xi32>
    %25 = vector.shape_cast %22 : vector<8x128xi32> to vector<1x8x128xi32>
    tpu.vector_store %arg4[%c0_10, %c0_11, %c0_12], %25 {strides = array<i32>} : memref<1x8x128xi32, #tpu.memory_space<vmem>>, vector<1x8x128xi32>,
    return
  }
  func.func @transform_0(%arg0: i32) -> (i32, i32) {
    %c0_i32 = arith.constant 0 : i32
    %c0_i32_0 = arith.constant 0 : i32
    return %arg0, %c0_i32 : i32, i32
  }
  func.func @transform_1(%arg0: i32) -> (i32, i32) {
    %c0_i32 = arith.constant 0 : i32
    %c0_i32_0 = arith.constant 0 : i32
    return %arg0, %c0_i32 : i32, i32
  }
  func.func @transform_2(%arg0: i32) -> (i32, i32, i32) {
    %c0_i32 = arith.constant 0 : i32
    %c0_i32_0 = arith.constant 0 : i32
    %c0_i32_1 = arith.constant 0 : i32
    return %arg0, %c0_i32, %c0_i32_0 : i32, i32, i32
  }
  func.func @transform_3(%arg0: i32) -> (i32, i32, i32) {
    %c0_i32 = arith.constant 0 : i32
    %c0_i32_0 = arith.constant 0 : i32
    %c0_i32_1 = arith.constant 0 : i32
    return %arg0, %c0_i32, %c0_i32_0 : i32, i32, i32
  }
}

</mosaic_0001>

<bundles_post_ra>
// kernel: tpu_custom_call.1
= control target key start
LH: loop header
LB: loop body
LE: loop exit
PB: predicated region body
PF: predicated region fallthrough
CT: control target
= control target key end

     0   :  { %9 = vsyncpa [#allocation3], 0  ;;  %s280_s0 = inlined_call_operand.hbm [shape: f32[16,128], index: 0, kind: input, shape index: {}]   ;;  %s281_s1 = inlined_call_operand.hbm [shape: f32[16,128], index: 1, kind: input, shape index: {}]   ;;  %s282_s2 = inlined_call_operand.hbm [shape: f32[1,8,128], index: 2, kind: output, shape index: {0}]   ;;  %s283_s3 = inlined_call_operand.hbm [shape: s32[1,8,128], index: 3, kind: output, shape index: {1}]  }
   0x1   :  { %10 = vsyncpa [#allocation6], 0 }
   0x2   :  { %11 = vsyncpa [#allocation4], 0 }
   0x3   :  { %12 = vsyncpa [#allocation9], 0  ;;  %s205_s12 = smov [#allocation2]   ;;  %s109_s16 = scalar_lea.hbm %s280_s0, 256 }
   0x4   :  { %s18_s13 = sshll.u32 %s205_s12, 4  ;;  %p110_p0 = scmp.ne.s32.totalorder %s280_s0, %s109_s16  ;;  %s19_s13 = int_to_ptr.vmem [resolvable:$true] %s18_s13 }
   0x5   :  { %p113_p1 = scmp.lt.u32.totalorder %s109_s16, %s280_s0 }
   0x7   :  { %p115_p2 = pnand %p113_p1, %p110_p0 }
   0x9   :  { %118 = shalt.err (!%p115_p2)
}
   0xa   :  { %s119_s21 = scalar_lea.vmem %s19_s13, 256  ;;  %p124_p4 = scmp.lt.s32.totalorder %s19_s13, %s19_s13 }
   0xb   :  { %p120_p3 = scmp.ne.s32.totalorder %s19_s13, %s119_s21  ;;  %p125_p5 = scmp.lt.s32.totalorder %s119_s21, %s119_s21 }
   0xd   :  { %p126_p6 = por %p125_p5, %p124_p4 }
   0xf   :  { %p127_p7 = pnand %p126_p6, %p120_p3 }
  0x11   :  { %130 = shalt.err (!%p127_p7)
}
  0x12   :  { %s206_s22 = smov 128   ;;  %s207_s23 = smov 8  }
  0x13   :  { %24 = dma.hbm_to_vmem [thread:$0]  %s280_s0, 256, %s19_s13, [#allocation3], %s206_s22, %s206_s22, %s207_s23  }
  0x14   :  { %s208_s26 = smov [#allocation5]   ;;  %s131_s30 = scalar_lea.hbm %s281_s1, 256 }
  0x15   :  { %s30_s27 = sshll.u32 %s208_s26, 4  ;;  %p132_p8 = scmp.ne.s32.totalorder %s281_s1, %s131_s30  ;;  %s31_s27 = int_to_ptr.vmem [resolvable:$true] %s30_s27 }
  0x16   :  { %p135_p9 = scmp.lt.u32.totalorder %s131_s30, %s281_s1 }
  0x18   :  { %p137_p10 = pnand %p135_p9, %p132_p8 }
  0x1a   :  { %140 = shalt.err (!%p137_p10)
}
  0x1b   :  { %s141_s8 = scalar_lea.vmem %s31_s27, 256  ;;  %p146_p12 = scmp.lt.s32.totalorder %s31_s27, %s31_s27 }
  0x1c   :  { %p142_p11 = scmp.ne.s32.totalorder %s31_s27, %s141_s8  ;;  %p147_p13 = scmp.lt.s32.totalorder %s141_s8, %s141_s8 }
  0x1e   :  { %p148_p0 = por %p147_p13, %p146_p12 }
  0x20   :  { %p149_p1 = pnand %p148_p0, %p142_p11 }
  0x22   :  { %152 = shalt.err (!%p149_p1)
}
  0x23   :  { %36 = dma.hbm_to_vmem [thread:$0]  %s281_s1, 256, %s31_s27, [#allocation6], %s206_s22, %s206_s22, %s207_s23  }
  0x24   :  { %197 = dma.done.wait [#allocation3], 256  }
  0x25   :  { %198 = vsyncadd [#allocation3], 4294967040 }
  0x26   :  { %199 = dma.done.wait [#allocation6], 256  }
  0x27   :  { %200 = vsyncadd [#allocation6], 4294967040  ;;  %v43_v0 = vld [vmem:[#allocation5] sm:$0xff]  ;;  %v44_v1 = vld [vmem:[#allocation5 + $0x8] sm:$0xff]  ;;  %s209_s10 = smov [#allocation8]   ;;  %v210_v6 = vmov 0  }
  0x28   :  { %v45_v2 = vld [vmem:[#allocation2] sm:$0xff]  ;;  %s88_s11 = sshll.u32 %s209_s10, 4  ;;  %v46_v3 = vld [vmem:[#allocation2 + $0x8] sm:$0xff]  ;;  %vm54_vm0 = vcmp.gt.f32.partialorder %v43_v0, 0.0  ;;  %vm55_vm1 = vcmp.gt.f32.partialorder %v44_v1, 0.0  ;;  %s211_s1 = smov [#allocation7]   ;;  %s89_s11 = int_to_ptr.vmem [resolvable:$true] %s88_s11 }
  0x29   :  { %v60_v4 = vsub.f32 %v43_v0, %v45_v2  ;;  %v61_v5 = vsub.f32 %v44_v1, %v46_v3  ;;  %v68_v7 = vsel %vm54_vm0, 1, %v210_v6  ;;  %v69_v8 = vsel %vm55_vm1, 1, %v210_v6  ;;  %s78_s12 = sshll.u32 %s211_s1, 4  ;;  %s153_s13 = scalar_lea.vmem %s89_s11, 128  ;;  %s79_s12 = int_to_ptr.vmem [resolvable:$true] %s78_s12 }
  0x2a   :  { %v70_v10 = vadd.s32 %v69_v8, %v68_v7  ;;  %p154_p2 = scmp.ne.s32.totalorder %s89_s11, %s153_s13  ;;  %p158_p3 = scmp.lt.s32.totalorder %s89_s11, %s89_s11 }
  0x2b   :  { %v62_v9 = vsel %vm54_vm0, %v60_v4, 0.0  ;;  %v63_v11 = vsel %vm55_vm1, %v61_v5, 0.0  ;;  %p159_p4 = scmp.lt.s32.totalorder %s153_s13, %s153_s13 }
  0x2c   :  { %v64_v12 = vmul.f32 %v62_v9, %v62_v9  ;;  %v65_v13 = vmul.f32 %v63_v11, %v63_v11  ;;  %71 = vst [vmem:[#allocation8] sm:$0xff] %v70_v10 }
  0x2d   :  { %p160_p5 = por %p159_p4, %p158_p3 }
  0x2f   :  { %p161_p6 = pnand %p160_p5, %p154_p2 }
  0x31   :  { %164 = shalt.err (!%p161_p6)
}
  0x32   :  { %s165_s16 = scalar_lea.hbm %s283_s3, 128 }
  0x33   :  { %p166_p7 = scmp.ne.s32.totalorder %s283_s3, %s165_s16  ;;  %p169_p8 = scmp.lt.u32.totalorder %s165_s16, %s283_s3 }
  0x35   :  { %p171_p9 = pnand %p169_p8, %p166_p7 }
  0x37   :  { %174 = shalt.err (!%p171_p9)
}
  0x38   :  { %91 = dma.vmem_to_hbm [thread:$0]  %s89_s11, 128, %s283_s3, [#allocation9]   ;;  %v66_v14 = vadd.f32 %v65_v13, %v64_v12 }
  0x39   :  { %s175_s23 = scalar_lea.vmem %s79_s12, 128  ;;  %p180_p11 = scmp.lt.s32.totalorder %s79_s12, %s79_s12 }
  0x3a   :  { %67 = vst [vmem:[#allocation7] sm:$0xff] %v66_v14  ;;  %p176_p10 = scmp.ne.s32.totalorder %s79_s12, %s175_s23  ;;  %p181_p12 = scmp.lt.s32.totalorder %s175_s23, %s175_s23 }
  0x3c   :  { %p182_p13 = por %p181_p12, %p180_p11 }
  0x3e   :  { %p183_p0 = pnand %p182_p13, %p176_p10 }
  0x40   :  { %186 = shalt.err (!%p183_p0)
}
  0x41   :  { %s187_s26 = scalar_lea.hbm %s282_s2, 128 }
  0x42   :  { %p188_p1 = scmp.ne.s32.totalorder %s282_s2, %s187_s26  ;;  %p191_p2 = scmp.lt.u32.totalorder %s187_s26, %s282_s2 }
  0x44   :  { %p193_p3 = pnand %p191_p2, %p188_p1 }
  0x46   :  { %196 = shalt.err (!%p193_p3)
}
  0x47   :  { %81 = dma.vmem_to_hbm [thread:$0]  %s79_s12, 128, %s282_s2, [#allocation4]  }
  0x48   :  { %201 = dma.done.wait [#allocation4], 128  }
  0x49   :  { %202 = vsyncadd [#allocation4], 4294967168 }
  0x4a   :  { %203 = dma.done.wait [#allocation9], 128  }
  0x4b   :  { %204 = vsyncadd [#allocation9], 4294967168 }
  0x4c   :  { %98 = vsyncpa [#allocation3], 1 }
  0x4d   :  { %99 = vsyncpa [#allocation6], 1 }
  0x4e   :  { %100 = vsyncpa [#allocation4], 1 }
  0x4f   :  { %101 = vsyncpa [#allocation9], 1 }

</bundles_post_ra>
